<compile_context>
chip_gen: v7x
topology: tpu7x:2x2x1
jax: 0.10.0
libtpu: 0.0.40
codegen_flags: <defaults>
</compile_context>

<pallas_src>
import jax
import jax.numpy as jnp
from jax.experimental import pallas as pl
from jax.experimental.pallas import tpu as pltpu


def xgcn_kernel(emb_ref, adj_ref, w1_ref, w2_ref, wfct_ref, out_ref):
    # One grid step processes a block of Bt batch elements entirely in VMEM.
    Bt, N, F = emb_ref.shape
    H = w1_ref.shape[1]
    C = wfct_ref.shape[1]

    emb = emb_ref[...]        # (Bt, N, F)  bf16
    adj = adj_ref[...]        # (Bt, N, N)  bf16
    w1 = w1_ref[...]          # (F, H)      bf16 (VMEM-resident across steps)
    w2 = w2_ref[...]          # (H, H)      bf16 (VMEM-resident across steps)
    wfct = wfct_ref[...]      # (H, C)      bf16 (VMEM-resident across steps)

    # --- xgc1: support = relu(emb @ W1); h1 = adj @ support (batched) ---
    # Fuse all Bt*N rows into a single MXU matmul to fill the M dimension.
    s1 = jnp.dot(emb.reshape(Bt * N, F), w1,
                 preferred_element_type=jnp.float32)                    # (Bt*N, H) f32
    s1 = jnp.maximum(s1, 0.0).astype(jnp.bfloat16).reshape(Bt, N, H)
    h1 = jnp.einsum('bnm,bmh->bnh', adj, s1,
                    preferred_element_type=jnp.float32)                 # (Bt, N, H) f32

    # dropout (eval mode) -> identity
    # TODO(synk): training-mode dropout (stochastic mask) not implemented.

    # --- xgc2: support = relu(h1 @ W2); h2 = adj @ support (batched) ---
    s2 = jnp.dot(h1.astype(jnp.bfloat16).reshape(Bt * N, H), w2,
                 preferred_element_type=jnp.float32)                    # (Bt*N, H) f32
    s2 = jnp.maximum(s2, 0.0).astype(jnp.bfloat16).reshape(Bt, N, H)
    h2 = jnp.einsum('bnm,bmh->bnh', adj, s2,
                    preferred_element_type=jnp.float32)                 # (Bt, N, H) f32

    # --- XMaxPool2d(kernel_size=(pad, 1)) with pad == N: max over node axis ---
    pooled = jnp.max(h2, axis=1)                                        # (Bt, H) f32

    # --- xfc: Linear(nhid, nclass, bias=None); weight pre-transposed to (H, C) ---
    logits = jnp.dot(pooled.astype(jnp.bfloat16), wfct,
                     preferred_element_type=jnp.float32)                # (Bt, C) f32

    # --- log_softmax over classes (f32) ---
    m = jnp.max(logits, axis=1, keepdims=True)
    lse = m + jnp.log(jnp.sum(jnp.exp(logits - m), axis=1, keepdims=True))
    out_ref[...] = (logits - lse).reshape(Bt, 1, C).astype(out_ref.dtype)


def _pick_batch_tile(B, N, F, H, vmem_budget_bytes=24 << 20):
    """Largest divisor of B whose block fits the VMEM budget, keeping >= 2 grid
    steps whenever B >= 2 so both v7x TensorCores receive work."""
    def bytes_for(bt):
        inputs = 2 * bt * (N * F + N * N) * 2     # bf16 inputs, double-buffered
        acts = 6 * bt * N * H * 4                 # f32 intermediates (generous)
        return inputs + acts

    best = 1
    for bt in range(1, B + 1):
        if B % bt != 0:
            continue
        if bytes_for(bt) > vmem_budget_bytes:
            continue
        if B // bt >= 2 or B == 1:
            best = bt
    return best


def xgcn_forward(embedding, adjacency, w1, w2, wfc, *, batch_tile=None):
    B, N, F = embedding.shape
    H = w1.shape[1]
    C = wfc.shape[0]

    Bt = _pick_batch_tile(B, N, F, H) if batch_tile is None else batch_tile
    assert B % Bt == 0, "batch tile must divide batch size"
    num_steps = B // Bt

    # bf16 matmul inputs (f32 accumulation happens inside the kernel).
    emb_bf = embedding.astype(jnp.bfloat16)
    adj_bf = adjacency.astype(jnp.bfloat16)
    w1_bf = w1.astype(jnp.bfloat16)
    w2_bf = w2.astype(jnp.bfloat16)
    wfc_t = wfc.T.astype(jnp.bfloat16)        # pre-transposed once: (H, C)

    # Scoped-VMEM estimate: double-buffered inputs + resident weights +
    # f32 activations + output blocks.
    vmem_est = (2 * Bt * (N * F + N * N) * 2          # emb + adj blocks (bf16, x2)
                + (F * H + H * H + H * C) * 2          # resident weights (bf16)
                + 8 * Bt * N * H * 4                   # f32 intermediates (generous)
                + 2 * Bt * C * 4)                      # output block (f32, x2)
    vmem_limit = int(min(48 << 20, max(4 << 20, 4 * vmem_est)))

    # Advisory cost hint for XLA's scheduler.
    flops = 2 * B * N * (F * H + N * H + H * H + N * H) + 2 * B * H * C
    bytes_accessed = (emb_bf.size + adj_bf.size + w1_bf.size + w2_bf.size
                      + wfc_t.size) * 2 + B * C * 4
    cost = pl.CostEstimate(flops=flops, transcendentals=2 * B * C,
                           bytes_accessed=bytes_accessed)

    out = pl.pallas_call(
        xgcn_kernel,
        out_shape=jax.ShapeDtypeStruct((B, 1, C), jnp.float32),
        grid_spec=pltpu.PrefetchScalarGridSpec(
            num_scalar_prefetch=0,
            grid=(num_steps,),
            in_specs=[
                pl.BlockSpec((Bt, N, F), lambda b: (b, 0, 0)),   # embedding block
                pl.BlockSpec((Bt, N, N), lambda b: (b, 0, 0)),   # adjacency block
                pl.BlockSpec((F, H), lambda b: (0, 0)),          # W1 (VMEM-resident)
                pl.BlockSpec((H, H), lambda b: (0, 0)),          # W2 (VMEM-resident)
                pl.BlockSpec((H, C), lambda b: (0, 0)),          # Wfc^T (VMEM-resident)
            ],
            out_specs=pl.BlockSpec((Bt, 1, C), lambda b: (b, 0, 0)),
        ),
        compiler_params=pltpu.CompilerParams(
            dimension_semantics=("parallel",),
            vmem_limit_bytes=vmem_limit),
        cost_estimate=cost,
    )(emb_bf, adj_bf, w1_bf, w2_bf, wfc_t)
    return out.reshape(B, C)


def xgcn_reference_f32(embedding, adjacency, w1, w2, wfc):
    # Pure-JAX f32 reference mirroring the PyTorch eval-mode forward.
    s1 = jax.nn.relu(jnp.einsum('bnf,fh->bnh', embedding, w1))
    h1 = jnp.einsum('bnm,bmh->bnh', adjacency, s1)
    s2 = jax.nn.relu(jnp.einsum('bnh,hk->bnk', h1, w2))
    h2 = jnp.einsum('bnm,bmh->bnh', adjacency, s2)
    pooled = jnp.max(h2, axis=1)
    logits = pooled @ wfc.T
    return jax.nn.log_softmax(logits, axis=1)


def xgcn_reference_bf16(embedding, adjacency, w1, w2, wfc):
    # Reference that mirrors the kernel's bf16-input / f32-accumulation casts.
    bf = jnp.bfloat16
    emb = embedding.astype(bf)
    adj = adjacency.astype(bf)
    s1 = jax.nn.relu(jnp.einsum('bnf,fh->bnh', emb, w1.astype(bf),
                                preferred_element_type=jnp.float32)).astype(bf)
    h1 = jnp.einsum('bnm,bmh->bnh', adj, s1, preferred_element_type=jnp.float32)
    s2 = jax.nn.relu(jnp.einsum('bnh,hk->bnk', h1.astype(bf), w2.astype(bf),
                                preferred_element_type=jnp.float32)).astype(bf)
    h2 = jnp.einsum('bnm,bmh->bnh', adj, s2, preferred_element_type=jnp.float32)
    pooled = jnp.max(h2, axis=1)
    logits = jnp.einsum('bh,hc->bc', pooled.astype(bf), wfc.T.astype(bf),
                        preferred_element_type=jnp.float32)
    return jax.nn.log_softmax(logits, axis=1)


if __name__ == "__main__":
    # Small shapes consistent with the module: nfeat=32, nhid=32, nclass=8,
    # pad == number of nodes (required so the squeezes in forward are valid).
    B, N, NFEAT, NHID, NCLASS = 8, 16, 32, 32, 8
    PAD = N  # XMaxPool2d(kernel_size=(PAD, 1)) reduces over all N nodes.

    key = jax.random.PRNGKey(0)
    k_emb, k_adj, k_w1, k_w2, k_wfc = jax.random.split(key, 5)

    embedding = jax.random.normal(k_emb, (B, N, NFEAT), dtype=jnp.float32)
    adjacency = jax.random.uniform(k_adj, (B, N, N), dtype=jnp.float32)
    # Row-normalize the adjacency (typical GCN preprocessing; keeps magnitudes sane).
    adjacency = adjacency / jnp.sum(adjacency, axis=-1, keepdims=True)

    # Parameter init mimicking XGraphConvolution.reset_parameters
    # (uniform(-stdv, stdv) with stdv = 1/sqrt(features_out)); Wfc like nn.Linear.
    stdv = 1.0 / (NHID ** 0.5)
    w1 = jax.random.uniform(k_w1, (NFEAT, NHID), jnp.float32, -stdv, stdv)
    w2 = jax.random.uniform(k_w2, (NHID, NHID), jnp.float32, -stdv, stdv)
    wfc = jax.random.uniform(k_wfc, (NCLASS, NHID), jnp.float32, -stdv, stdv)

    out = xgcn_forward(embedding, adjacency, w1, w2, wfc)
    out = jax.block_until_ready(out)
    assert out.shape == (B, NCLASS)

    # Tight check against a reference with the identical bf16/f32 mixed precision.
    ref_bf16 = xgcn_reference_bf16(embedding, adjacency, w1, w2, wfc)
    assert jnp.allclose(out, ref_bf16, rtol=1e-2, atol=1e-2), \
        "mismatch vs bf16-mirrored reference"

    # Loose semantic check against the full-f32 reference.
    ref_f32 = xgcn_reference_f32(embedding, adjacency, w1, w2, wfc)
    assert jnp.allclose(out, ref_f32, rtol=5e-2, atol=5e-2), \
        "mismatch vs f32 reference"

    print("KERNEL_OK")
</pallas_src>

<mosaic_0001>
module attributes {stable_mosaic.version = 11 : i64} {
  func.func @xgcn_kernel(%arg0: i32, %arg1: memref<4x16x32xbf16, #tpu.memory_space<vmem>>, %arg2: memref<4x16x16xbf16, #tpu.memory_space<vmem>>, %arg3: memref<32x32xbf16, #tpu.memory_space<vmem>>, %arg4: memref<32x32xbf16, #tpu.memory_space<vmem>>, %arg5: memref<32x8xbf16, #tpu.memory_space<vmem>>, %arg6: memref<4x1x8xf32, #tpu.memory_space<vmem>>) attributes {dimension_semantics = [#tpu.dimension_semantics<parallel>], iteration_bounds = array<i64: 2>, scalar_prefetch = 0 : i64, scratch_operands = 0 : i64, tpu.core_type = #tpu.core_type<tc>, window_params = [{transform_indices = @transform_0, window_bounds = array<i64: 4, 16, 32>}, {transform_indices = @transform_1, window_bounds = array<i64: 4, 16, 16>}, {pipeline_mode = #tpu.pipeline_mode<synchronous>, transform_indices = @transform_2, window_bounds = array<i64: 32, 32>}, {pipeline_mode = #tpu.pipeline_mode<synchronous>, transform_indices = @transform_3, window_bounds = array<i64: 32, 32>}, {pipeline_mode = #tpu.pipeline_mode<synchronous>, transform_indices = @transform_4, window_bounds = array<i64: 32, 8>}, {transform_indices = @transform_5, window_bounds = array<i64: 4, 1, 8>}]} {
    %c0 = arith.constant 0 : index
    %c0_0 = arith.constant 0 : index
    %c0_1 = arith.constant 0 : index
    %0 = vector.load %arg1[%c0, %c0_0, %c0_1] : memref<4x16x32xbf16, #tpu.memory_space<vmem>>, vector<4x16x32xbf16>
    %c0_2 = arith.constant 0 : index
    %c0_3 = arith.constant 0 : index
    %c0_4 = arith.constant 0 : index
    %1 = vector.load %arg2[%c0_2, %c0_3, %c0_4] : memref<4x16x16xbf16, #tpu.memory_space<vmem>>, vector<4x16x16xbf16>
    %c0_5 = arith.constant 0 : index
    %c0_6 = arith.constant 0 : index
    %2 = vector.load %arg3[%c0_5, %c0_6] : memref<32x32xbf16, #tpu.memory_space<vmem>>, vector<32x32xbf16>
    %c0_7 = arith.constant 0 : index
    %c0_8 = arith.constant 0 : index
    %3 = vector.load %arg4[%c0_7, %c0_8] : memref<32x32xbf16, #tpu.memory_space<vmem>>, vector<32x32xbf16>
    %c0_9 = arith.constant 0 : index
    %c0_10 = arith.constant 0 : index
    %4 = vector.load %arg5[%c0_9, %c0_10] : memref<32x8xbf16, #tpu.memory_space<vmem>>, vector<32x8xbf16>
    %5 = vector.shape_cast %0 : vector<4x16x32xbf16> to vector<64x32xbf16>
    %cst = arith.constant dense<0.000000e+00> : vector<64x32xf32>
    %6 = tpu.matmul %5, %2, %cst {dimension_numbers = #tpu.dot_dimension_numbers<[1], [0], [0], [1], [0, 0, 1, 1], [], []>} : vector<64x32xbf16>, vector<32x32xbf16>, vector<64x32xf32> -> vector<64x32xf32>
    %cst_11 = arith.constant 0.000000e+00 : f32
    %7 = vector.broadcast %cst_11 : f32 to vector<64x32xf32>
    %8 = arith.maximumf %6, %7 : vector<64x32xf32>
    %9 = arith.truncf %8 : vector<64x32xf32> to vector<64x32xbf16>
    %10 = vector.shape_cast %9 : vector<64x32xbf16> to vector<4x16x32xbf16>
    "tpu.trace_start"() <{level = 10 : i32, message = "bnm,bmh->bnh"}> : () -> ()
    %cst_12 = arith.constant dense<0.000000e+00> : vector<4x16x32xf32>
    %11 = tpu.matmul %1, %10, %cst_12 {dimension_numbers = #tpu.dot_dimension_numbers<[2], [1], [1], [2], [0, 0, 0, 1, 1, 2], [0], [0]>} : vector<4x16x16xbf16>, vector<4x16x32xbf16>, vector<4x16x32xf32> -> vector<4x16x32xf32>
    "tpu.trace_stop"() : () -> ()
    %12 = arith.truncf %11 : vector<4x16x32xf32> to vector<4x16x32xbf16>
    %13 = vector.shape_cast %12 : vector<4x16x32xbf16> to vector<64x32xbf16>
    %cst_13 = arith.constant dense<0.000000e+00> : vector<64x32xf32>
    %14 = tpu.matmul %13, %3, %cst_13 {dimension_numbers = #tpu.dot_dimension_numbers<[1], [0], [0], [1], [0, 0, 1, 1], [], []>} : vector<64x32xbf16>, vector<32x32xbf16>, vector<64x32xf32> -> vector<64x32xf32>
    %cst_14 = arith.constant 0.000000e+00 : f32
    %15 = vector.broadcast %cst_14 : f32 to vector<64x32xf32>
    %16 = arith.maximumf %14, %15 : vector<64x32xf32>
    %17 = arith.truncf %16 : vector<64x32xf32> to vector<64x32xbf16>
    %18 = vector.shape_cast %17 : vector<64x32xbf16> to vector<4x16x32xbf16>
    "tpu.trace_start"() <{level = 10 : i32, message = "bnm,bmh->bnh"}> : () -> ()
    %cst_15 = arith.constant dense<0.000000e+00> : vector<4x16x32xf32>
    %19 = tpu.matmul %1, %18, %cst_15 {dimension_numbers = #tpu.dot_dimension_numbers<[2], [1], [1], [2], [0, 0, 0, 1, 1, 2], [0], [0]>} : vector<4x16x16xbf16>, vector<4x16x32xbf16>, vector<4x16x32xf32> -> vector<4x16x32xf32>
    "tpu.trace_stop"() : () -> ()
    %cst_16 = arith.constant dense<0xFF800000> : vector<4x32xf32>
    %20 = vector.multi_reduction <maximumf>, %19, %cst_16 [1] : vector<4x16x32xf32> to vector<4x32xf32>
    %21 = arith.truncf %20 : vector<4x32xf32> to vector<4x32xbf16>
    %cst_17 = arith.constant dense<0.000000e+00> : vector<4x8xf32>
    %22 = tpu.matmul %21, %4, %cst_17 {dimension_numbers = #tpu.dot_dimension_numbers<[1], [0], [0], [1], [0, 0, 1, 1], [], []>} : vector<4x32xbf16>, vector<32x8xbf16>, vector<4x8xf32> -> vector<4x8xf32>
    %cst_18 = arith.constant dense<0xFF800000> : vector<4xf32>
    %23 = vector.multi_reduction <maximumf>, %22, %cst_18 [1] : vector<4x8xf32> to vector<4xf32>
    %24 = vector.shape_cast %23 : vector<4xf32> to vector<4x1xf32>
    %25 = vector.broadcast %24 : vector<4x1xf32> to vector<4x8xf32>
    %26 = arith.subf %22, %25 : vector<4x8xf32>
    %27 = math.exp %26 : vector<4x8xf32>
    %cst_19 = arith.constant dense<0.000000e+00> : vector<4xf32>
    %28 = vector.multi_reduction <add>, %27, %cst_19 [1] : vector<4x8xf32> to vector<4xf32>
    %29 = vector.shape_cast %28 : vector<4xf32> to vector<4x1xf32>
    %30 = math.log %29 : vector<4x1xf32>
    %31 = arith.addf %24, %30 : vector<4x1xf32>
    %32 = vector.broadcast %31 : vector<4x1xf32> to vector<4x8xf32>
    %33 = arith.subf %22, %32 : vector<4x8xf32>
    %34 = vector.shape_cast %33 : vector<4x8xf32> to vector<4x1x8xf32>
    %c0_20 = arith.constant 0 : index
    %c0_21 = arith.constant 0 : index
    %c0_22 = arith.constant 0 : index
    %35 = vector.load %arg6[%c0_20, %c0_21, %c0_22] : memref<4x1x8xf32, #tpu.memory_space<vmem>>, vector<4x1x8xf32>
    tpu.vector_store %arg6[%c0_20, %c0_21, %c0_22], %34 {strides = array<i32>} : memref<4x1x8xf32, #tpu.memory_space<vmem>>, vector<4x1x8xf32>,
    return
  }
  func.func @transform_0(%arg0: i32) -> (i32, i32, i32) {
    %c0_i32 = arith.constant 0 : i32
    %c0_i32_0 = arith.constant 0 : i32
    %c0_i32_1 = arith.constant 0 : i32
    return %arg0, %c0_i32, %c0_i32_0 : i32, i32, i32
  }
  func.func @transform_1(%arg0: i32) -> (i32, i32, i32) {
    %c0_i32 = arith.constant 0 : i32
    %c0_i32_0 = arith.constant 0 : i32
    %c0_i32_1 = arith.constant 0 : i32
    return %arg0, %c0_i32, %c0_i32_0 : i32, i32, i32
  }
  func.func @transform_2(%arg0: i32) -> (i32, i32) {
    %c0_i32 = arith.constant 0 : i32
    %c0_i32_0 = arith.constant 0 : i32
    %c0_i32_1 = arith.constant 0 : i32
    return %c0_i32, %c0_i32_0 : i32, i32
  }
  func.func @transform_3(%arg0: i32) -> (i32, i32) {
    %c0_i32 = arith.constant 0 : i32
    %c0_i32_0 = arith.constant 0 : i32
    %c0_i32_1 = arith.constant 0 : i32
    return %c0_i32, %c0_i32_0 : i32, i32
  }
  func.func @transform_4(%arg0: i32) -> (i32, i32) {
    %c0_i32 = arith.constant 0 : i32
    %c0_i32_0 = arith.constant 0 : i32
    %c0_i32_1 = arith.constant 0 : i32
    return %c0_i32, %c0_i32_0 : i32, i32
  }
  func.func @transform_5(%arg0: i32) -> (i32, i32, i32) {
    %c0_i32 = arith.constant 0 : i32
    %c0_i32_0 = arith.constant 0 : i32
    %c0_i32_1 = arith.constant 0 : i32
    return %arg0, %c0_i32, %c0_i32_0 : i32, i32, i32
  }
}

</mosaic_0001>

<bundles_post_ra>
// kernel: tpu_custom_call.1
= control target key start
LH: loop header
LB: loop body
LE: loop exit
PB: predicated region body
PF: predicated region fallthrough
CT: control target
= control target key end

     0   :  { %s1998_s0 = inlined_call_operand.hbm [shape: bf16[8,16,32], index: 0, kind: input, shape index: {}]   ;;  %s1999_s1 = inlined_call_operand.hbm [shape: bf16[8,16,16], index: 1, kind: input, shape index: {}]   ;;  %s2000_s2 = inlined_call_operand.vmem [shape: bf16[32,32], index: 2, kind: input, shape index: {}]   ;;  %s2001_s3 = inlined_call_operand.hbm [shape: bf16[32,32], index: 3, kind: input, shape index: {}]   ;;  %s2002_s4 = inlined_call_operand.vmem [shape: bf16[32,8], index: 4, kind: input, shape index: {}]   ;;  %s2003_s5 = inlined_call_operand.hbm [shape: f32[8,1,8], index: 5, kind: output, shape index: {}]  }
   0x1   :  { %2012 = sst [smem:[#allocation15_spill]] %s1998_s0 }
   0x2   :  { %2013 = sst [smem:[#allocation16_spill]] %s2001_s3 }
   0x3   :  { %10 = vsyncpa [#allocation3], 0 }
   0x4   :  { %12 = vsyncpa [#allocation3 + $0x1], 0 }
   0x5   :  { %13 = vsyncpa [#allocation6], 0 }
   0x6   :  { %15 = vsyncpa [#allocation6 + $0x1], 0 }
   0x7   :  { %16 = vsyncpa [#allocation4], 0 }
   0x8   :  { %18 = vsyncpa [#allocation4 + $0x1], 0  ;;  %s1657_s18 = smov 0   ;;  %s1659_s19 = smov 0  }
   0x9   :  { %s1661_s20 = smov 0   ;;  %s1663_s21 = smov 0  }
   0xa LB: > { %2014 = sst [smem:[#allocation13_spill]] %s1610_s20  ;;  %s1678_s22 = sadd.s32 4294967295, %s1614_s21   ;;  %s1614_s21 = sphi %s1663_s21, %s2037_s21   ;;  %s1610_s20 = sphi %s1661_s20, %s2034_s20   ;;  %s1606_s19 = sphi %s1659_s19, %s2036_s19   ;;  %s1602_s18 = sphi %s1657_s18, %s2035_s18  }
   0xb   : > { %s1196_s23 = sadd.s32 4294967294, %s1614_s21   ;;  %p44_p0 = scmp.ne.s32.totalorder %s1606_s19, %s1602_s18 }
   0xc   : > { %p2004_p1 = scmp.eq.s32.totalorder %s1678_s22, 0  ;;  %p163_p3 = scmp.eq.s32.totalorder %s1196_s23, 1 }
   0xd   : > { %p1197_p5 = scmp.ge.s32.totalorder %s1614_s21, 1  ;;  %p170_p7 = scmp.lt.s32.totalorder %s1614_s21, 3 }
   0xe   : > { %p1687_p4 = por %p2004_p1, %p44_p0  ;;  %p1692_p6 = por %p163_p3, %p44_p0 }
   0xf   : > { %p1697_p8 = pnand %p1197_p5, %p170_p7  ;;  %s1616_s27 = smov [#allocation7]  }
  0x10   : > { %s2015_s24 = scalar_select %p1687_p4, 1, 0 }
  0x11   : > { %s2016_s25 = scalar_select %p1692_p6, 1, 0 }
  0x12   : > { %s2017_s26 = scalar_select %p1697_p8, 1, 0 }
  0x13   : > { %s185_s28 = sshll.u32 %s1616_s27, 4  ;;  %p1375_p9 = pneg %p1697_p8  ;;  %s1701_s28 = int_to_ptr.vmem [resolvable:$true] %s185_s28 }
  0x14   : > { %s1713_s30 = sadd.s32 1, %s1614_s21   ;;  %s31_s6 = sadd.s32 1, %s1610_s20 }
  0x15   : > { %p1708_p11 = pnand %p1375_p9, %p2004_p1  ;;  %s28_s7 = ssub.s32 %s1614_s21, %s1713_s30 }
  0x16   : > { %s2019_s3 = sld [smem:[#allocation16_spill]] }
  0x17   : > { %p1454_p13 = pneg %p1708_p11 }
  0x1c   : > { %s1452_s10 = scalar_lea.hbm %s2019_s3, 256 }
  0x1d   : > { %p1453_p12 = scmp.ne.s32.totalorder %s2019_s3, %s1452_s10  ;;  %p1459_p5 = scmp.lt.u32.totalorder %s1452_s10, %s2019_s3 }
  0x1f   : > { %p1455_p0 = pnand %p1454_p13, %p1453_p12 }
  0x21   : > { %p1456_p3 = pneg %p1455_p0 }
  0x23   : > { %p1461_p7 = pnand %p1459_p5, %p1456_p3 }
  0x25   : > { %1464 = shalt.err (!%p1461_p7)
}
  0x26   : > { %s1465_s15 = scalar_lea.vmem %s1701_s28, 256  ;;  %p1473_p2 = scmp.lt.s32.totalorder %s1701_s28, %s1701_s28 }
  0x27   : > { %p1466_p9 = scmp.ne.s32.totalorder %s1701_s28, %s1465_s15  ;;  %p1474_p6 = scmp.lt.s32.totalorder %s1465_s15, %s1465_s15 }
  0x29   : > { %p1468_p10 = pnand %p1466_p9, %p1454_p13  ;;  %p1475_p4 = por %p1474_p6, %p1473_p2 }
  0x2b   : > { %p1469_p1 = pneg %p1468_p10 }
  0x2d   : > { %p1476_p8 = pnand %p1475_p4, %p1469_p1 }
  0x2f   : > { %1479 = shalt.err (!%p1476_p8)
}
  0x30   : > { %s2007_s16 = smov 64   ;;  %s2009_s17 = smov 4  }
  0x31   : > { %1378 = dma.hbm_to_vmem [thread:$0]  (!%p1708_p11), %s2019_s3, 256, %s1701_s28, [#allocation6], %s2007_s16, %s2007_s16, %s2009_s17  }
  0x32   : > { %p29_p1 = scmp.eq.s32.totalorder %s28_s7, 0  ;;  %p38_p2 = scmp.ne.s32.totalorder %s1610_s20, %s1606_s19 }
  0x33   : > { %p39_p4 = scmp.eq.s32.totalorder %s1614_s21, 0  ;;  %p1391_p6 = scmp.lt.s32.totalorder %s1614_s21, 2 }
  0x34   : > { %s1747_s8 = scalar_select %p29_p1, %s1610_s20, %s31_s6  }
  0x35   : > { %p40_p8 = por %p39_p4, %p38_p2  ;;  %p2021_p10 = scmp.eq.s32.totalorder %s1678_s22, 1 }
  0x36   : > { %2020 = sst [smem:[#allocation14_spill]] %s1747_s8  ;;  %s202_s29 = sand.u32 1, %s1610_s20  }
  0x37   : > { %p1751_p12 = por %p2021_p10, %p38_p2  ;;  %s1250_s10 = sshll.u32 %s1614_s21, 9 }
  0x38   : > { %s1757_s11 = sshll.u32 %s202_s29, 5  ;;  %s2023_s0 = sld [smem:[#allocation15_spill]] }
  0x39   : > { %s206_s6 = scalar_lea.vmem [#allocation2], %s1757_s11  ;;  %p1765_p11 = pnand %p1391_p6, %p40_p8 }
  0x3a   : > { %s214_s7 = sshll.u32 %s206_s6, 4  ;;  %s1774_s27 = scalar_lea.hbm %s1999_s1, %s1250_s10  ;;  %s1769_s7 = int_to_ptr.vmem [resolvable:$true] %s214_s7 }
  0x3b   : > { %s1776_s12 = scalar_lea.sflag [#allocation3], %s202_s29  ;;  %p1482_p0 = pneg %p1765_p11 }
  0x3e   : > { %s1762_s28 = scalar_lea.hbm %s2023_s0, %s1250_s10  ;;  %s1485_s17 = scalar_lea.hbm %s2023_s0, 1024 }
  0x3f   : > { %s1480_s13 = scalar_lea.hbm %s1762_s28, 512  ;;  %p1486_p7 = scmp.lt.u32.totalorder %s1762_s28, %s2023_s0 }
  0x40   : > { %p1481_p13 = scmp.ne.s32.totalorder %s1762_s28, %s1480_s13  ;;  %p1487_p9 = scmp.lt.u32.totalorder %s1485_s17, %s1480_s13 }
  0x41   : > { %p1489_p2 = scmp.lt.u32.totalorder %s1480_s13, %s1762_s28 }
  0x42   : > { %p1483_p3 = pnand %p1482_p0, %p1481_p13  ;;  %p1488_p1 = por %p1487_p9, %p1486_p7 }
  0x44   : > { %p1484_p5 = pneg %p1483_p3  ;;  %p1490_p4 = por %p1489_p2, %p1488_p1 }
  0x46   : > { %p1491_p6 = pnand %p1490_p4, %p1484_p5 }
  0x48   : > { %1494 = shalt.err (!%p1491_p6)
}
  0x49   : > { %s1495_s29 = scalar_lea.vmem %s1769_s7, 512  ;;  %s1619_s16 = smov [#allocation2]  }
  0x4a   : > { %p1496_p8 = scmp.ne.s32.totalorder %s1769_s7, %s1495_s29  ;;  %s1500_s10 = sshll.u32 %s1619_s16, 4  ;;  %s1501_s10 = int_to_ptr.vmem [resolvable:$false] %s1500_s10 }
  0x4b   : > { %s1502_s3 = scalar_lea.vmem %s1501_s10, 1024  ;;  %p1503_p3 = scmp.lt.s32.totalorder %s1769_s7, %s1501_s10 }
  0x4c   : > { %p1498_p10 = pnand %p1496_p8, %p1482_p0  ;;  %p1504_p7 = scmp.lt.s32.totalorder %s1502_s3, %s1495_s29 }
  0x4e   : > { %p1499_p13 = pneg %p1498_p10  ;;  %p1505_p9 = por %p1504_p7, %p1503_p3 }
  0x50   : > { %p1506_p1 = pnand %p1505_p9, %p1499_p13 }
  0x52   : > { %1509 = shalt.err (!%p1506_p1)
}
  0x53   : > { %s2025_s17 = smov 4   ;;  %s2026_s8 = smov 64  }
  0x54   : > { %1382 = dma.hbm_to_vmem [thread:$0]  (!%p1765_p11), %s1762_s28, 512, %s1769_s7, %s1776_s12, %s2026_s8, %s2026_s8, %s2025_s17  }
  0x55   : > { %s228_s15 = scalar_lea.vmem [#allocation5], %s1757_s11  ;;  %s224_s13 = sand.u32 1, %s1614_s21  }
  0x56   : > { %s236_s23 = sshll.u32 %s228_s15, 4  ;;  %s1811_s6 = scalar_lea.sflag [#allocation6], %s224_s13  ;;  %s1809_s23 = int_to_ptr.vmem [resolvable:$true] %s236_s23 }
  0x57   : > { %s1510_s29 = scalar_lea.hbm %s1774_s27, 512  ;;  %s1515_s3 = scalar_lea.hbm %s1999_s1, 1024 }
  0x58   : > { %p1511_p5 = scmp.ne.s32.totalorder %s1774_s27, %s1510_s29  ;;  %p1516_p6 = scmp.lt.u32.totalorder %s1774_s27, %s1999_s1 }
  0x59   : > { %p1517_p8 = scmp.lt.u32.totalorder %s1515_s3, %s1510_s29  ;;  %p1519_p13 = scmp.lt.u32.totalorder %s1510_s29, %s1774_s27 }
  0x5a   : > { %p1513_p2 = pnand %p1511_p5, %p1482_p0 }
  0x5b   : > { %p1518_p10 = por %p1517_p8, %p1516_p6 }
  0x5c   : > { %p1514_p4 = pneg %p1513_p2 }
  0x5d   : > { %p1520_p3 = por %p1519_p13, %p1518_p10 }
  0x5f   : > { %p1521_p7 = pnand %p1520_p3, %p1514_p4 }
  0x61   : > { %1524 = shalt.err (!%p1521_p7)
}
  0x62   : > { %s1525_s11 = scalar_lea.vmem %s1809_s23, 512  ;;  %s1620_s28 = smov [#allocation5]  }
  0x63   : > { %p1526_p9 = scmp.ne.s32.totalorder %s1809_s23, %s1525_s11  ;;  %s1530_s7 = sshll.u32 %s1620_s28, 4  ;;  %s1531_s7 = int_to_ptr.vmem [resolvable:$false] %s1530_s7 }
  0x64   : > { %s1532_s0 = scalar_lea.vmem %s1531_s7, 1024  ;;  %p1533_p2 = scmp.lt.s32.totalorder %s1809_s23, %s1531_s7 }
  0x65   : > { %p1528_p1 = pnand %p1526_p9, %p1482_p0  ;;  %p1534_p6 = scmp.lt.s32.totalorder %s1532_s0, %s1525_s11 }
  0x67   : > { %p1529_p5 = pneg %p1528_p1  ;;  %p1535_p8 = por %p1534_p6, %p1533_p2 }
  0x69   : > { %p1536_p10 = pnand %p1535_p8, %p1529_p5 }
  0x6b   : > { %1539 = shalt.err (!%p1536_p10)
}
  0x6c   : > { %1385 = dma.hbm_to_vmem [thread:$0]  (!%p1765_p11), %s1774_s27, 512, %s1809_s23, %s1811_s6, %s2026_s8, %s2026_s8, %s2025_s17  }
  0x6d   : > { %p2027_p0 = scmp.ne.s32.totalorder %s2017_s26, 0 }
  0x6e   : > { %s1843_s20 = sand.u32 (!%p2027_p0), 1, %s1606_s19   ;;  %p2028_p4 = scmp.ne.s32.totalorder (!%p2027_p0), %s2015_s24, 0 }
  0x6f   : > { %248 = sbr.rel (%p2027_p0) target bundleno = 1607 (0x647), region = 40  ;;  %s1209_s12 = sshll.u32 (!%p2027_p0), %s1843_s20, 5 }
  0x70   : > { %s251_s15 = scalar_lea.sflag (!%p2027_p0), [#allocation3], %s1843_s20  ;;  %s254_s13 = scalar_lea.vmem (!%p2027_p0), [#allocation2], %s1209_s12 }
  0x76   : > { %1585 = dma.done.wait (%p2028_p4), %s251_s15, 512  }
  0x77   : > { %1587 = vsyncadd (%p2028_p4), %s251_s15, 4294966784  ;;  %s259_s14 = sand.u32 1, %s1678_s22   ;;  %s1852_s26 = scalar_lea.vmem [#allocation5], %s1209_s12 }
  0x78   : > { %s260_s27 = scalar_lea.sflag [#allocation6], %s259_s14 }
  0x79   : > { %1589 = dma.done.wait (%p2028_p4), %s260_s27, 512  }
  0x7a   : > { %1591 = vsyncadd (%p2028_p4), %s260_s27, 4294966784  ;;  %p2029_p11 = scmp.eq.s32.totalorder %s1678_s22, 0 }
  0x7c   : > { %1593 = dma.done.wait (%p2029_p11), [#allocation6], 256   ;;  %p2030_p13 = pmov %p2029_p11 }
  0x7d   : > { %v1434_v0 = vld [vmem:[%s2000_s2] sm:$0xff]   ;;  %v1435_v1 = vld [vmem:[%s2000_s2 + $0x8] sm:$0xff]   ;;  %vm363_vm0 = vcmask 261120   ;;  %v1438_v4 = vld [vmem:[%s254_s13 + $0x10] sm:$0xff]   ;;  %v1621_v6 = vmov 0.0   ;;  %vm1622_vm1 = vmmov 0  }
  0x7e   : > { %1595 = vsyncadd (%p2030_p13), [#allocation6], 4294967040  ;;  %1285 = vmatprep.subr.bf16.mxu0 %v1434_v0  ;;  %v1436_v2 = vld [vmem:[%s254_s13] sm:$0xff]   ;;  %v1437_v3 = vld [vmem:[%s254_s13 + $0x8] sm:$0xff]   ;;  %1297 = vmatprep.subr.bf16.mxu1 %v1621_v6  ;;  %vm458_vm2 = vcmask 130048   ;;  %vm967_vm3 = vcmask 1041409  }
  0x7f   : > { %1286 = vmatpush3.bf16.msra.mxu0 %v1434_v0  ;;  %1289 = vmatprep.mubr.msk.bf16.mxu0 %vm363_vm0, %v1436_v2  ;;  %v1439_v5 = vld [vmem:[%s254_s13 + $0x18] sm:$0xff]   ;;  %v1879_v17 = vld [vmem:[%s1852_s26] sm:$0xff]   ;;  %v1891_v29 = vld [vmem:[%s1852_s26 + $0x8] sm:$0xff]   ;;  %vm969_vm4 = vcmask 1042434   ;;  %vm971_vm5 = vcmask 1043459   ;;  %vm1029_vm6 = vcmask 60416  }
  0x80   : > { %1287 = vmatprep.subr.bf16.mxu0 %v1435_v1  ;;  %1299 = vmatprep.mubr.msk.bf16.mxu1 %vm1622_vm1, %v1621_v6  ;;  %v1888_v28 = vld [vmem:[%s1852_s26 + $0x18] sm:$0xff]   ;;  %v1903_v30 = vld [vmem:[%s1852_s26 + $0x10] sm:$0xff]   ;;  %v1444_v31 = vld [vmem:[#allocation7] sm:$0xff]   ;;  %s1212_s3 = sshll.u32 %s1843_s20, 2  ;;  %vm1072_vm7 = vcmask 57344   ;;  %s1253_s11 = sshll.u32 %s1678_s22, 6 }
  0x81   : > { %v1445_v32 = vld [vmem:[#allocation7 + $0x8] sm:$0xff]   ;;  %s298_s28 = scalar_lea.vmem [#allocation8], %s1212_s3  ;;  %s1952_s15 = scalar_lea.hbm %s2003_s5, %s1253_s11 }
  0x82   : > { %s1091_s7 = sshll.u32 %s298_s28, 4  ;;  %s1078_s22 = scalar_lea.sflag [#allocation4], %s1843_s20  ;;  %s1954_s7 = int_to_ptr.vmem [resolvable:$true] %s1091_s7 }
  0x83   : > { %1288 = vmatpush3.bf16.msra.mxu0 %v1435_v1  ;;  %s1540_s13 = scalar_lea.vmem %s1954_s7, 64  ;;  %s1624_s14 = smov [#allocation8]  }
  0x84   : > { %1315 = vmatprep.subr.bf16.mxu0 %v1621_v6  ;;  %p1541_p3 = scmp.ne.s32.totalorder %s1954_s7, %s1540_s13  ;;  %s1544_s27 = sshll.u32 %s1624_s14, 4  ;;  %s1545_s27 = int_to_ptr.vmem [resolvable:$false] %s1544_s27 }
  0x85   : > { %s1546_s26 = scalar_lea.vmem %s1545_s27, 128  ;;  %p1547_p1 = scmp.lt.s32.totalorder %s1954_s7, %s1545_s27 }
  0x86   : > { %1290 = vmatmul.mubr.msk.bf16.vlgmr.msra.gmra.mrb[0].mxu0 %vm363_vm0, %v1437_v3  ;;  %p1542_p7 = pnand %p1541_p3, %p1751_p12  ;;  %p1548_p5 = scmp.lt.s32.totalorder %s1546_s26, %s1540_s13 }
  0x87   : > { %1293 = vmatprep.mubr.msk.bf16.mxu0 %vm363_vm0, %v1438_v4 }
  0x88   : > { %p1543_p9 = pneg %p1542_p7  ;;  %p1549_p2 = por %p1548_p5, %p1547_p1 }
  0x8a   : > { %p1550_p6 = pnand %p1549_p2, %p1543_p9 }
  0x8e   : > { %1294 = vmatmul.mubr.msk.bf16.gmra.mrb[4].mxu0 %vm363_vm0, %v1439_v5 }
  0x8f   : > { %1317 = vmatprep.mubr.msk.bf16.mxu0 %vm1622_vm1, %v1621_v6 }
 0x159   : > { %v1291_v7 = vpop.f32.mrb[0].mxu0 }
 0x15a   : > { %v410_v8 = vpop.f32.mrb[1].mxu0  ;;  %v443_v10 = vmax.f32 %v1291_v7, 0.0 }
 0x15b   : > { %v1292_v9 = vpop.f32.mrb[2].mxu0  ;;  %v441_v13 = vmax.f32 %v410_v8, 0.0 }
 0x15c   : > { %v444_v11 = vmax.f32 %v1292_v9, 0.0  ;;  %v413_v12 = vpop.f32.mrb[3].mxu0 }
 0x15d   : > { %v442_v14 = vmax.f32 %v413_v12, 0.0 }
 0x15e   : > { %v450_v15 = vpack.c.bf16 %v444_v11, %v443_v10  ;;  %v1446_v10 = vld [vmem:[%s2002_s4] sm:$0xff]   ;;  %v1447_v11 = vld [vmem:[%s2002_s4 + $0x8] sm:$0xff]  }
 0x15f   : > { %v449_v16 = vpack.c.bf16 %v442_v14, %v441_v13 }
 0x161   : > { %1298 = vmatpush3.bf16.msra.mxu1 %v449_v16  ;;  %v1295_v18 = vpop.f32.mrb[4].mxu0 }
 0x162   : > { %1303 = vmatprep.subr.bf16.mxu1 %v1621_v6  ;;  %v447_v19 = vmax.f32 %v1295_v18, 0.0  ;;  %v426_v20 = vpop.f32.mrb[5].mxu0 }
 0x163   : > { %v445_v21 = vmax.f32 %v426_v20, 0.0  ;;  %v1296_v22 = vpop.f32.mrb[6].mxu0 }
 0x164   : > { %1300 = vmatmul.mubr.msk.bf16.vlgmr.msra.gmra.mrb[0].mxu1 %vm458_vm2, %v1879_v17  ;;  %v448_v23 = vmax.f32 %v1296_v22, 0.0  ;;  %v429_v24 = vpop.f32.mrb[7].mxu0 }
 0x165   : > { %1304 = vmatpush3.bf16.msra.mxu1 %v450_v15  ;;  %v446_v25 = vmax.f32 %v429_v24, 0.0  ;;  %1305 = vmatprep.mubr.msk.bf16.mxu1 %vm1622_vm1, %v1621_v6 }
 0x166   : > { %v452_v26 = vpack.c.bf16 %v448_v23, %v447_v19  ;;  %1309 = vmatprep.subr.bf16.mxu1 %v1621_v6 }
 0x167   : > { %v451_v27 = vpack.c.bf16 %v446_v25, %v445_v21 }
 0x168   : > { %1316 = vmatpush3.bf16.msra.mxu0 %v452_v26 }
 0x169   : > { %1333 = vmatprep.subr.bf16.mxu0 %v1621_v6 }
 0x16b   : > { %1318 = vmatmul.mubr.msk.bf16.vlgmr.msra.gmra.mrb[8].mxu0 %vm458_vm2, %v1888_v28 }
 0x16c   : > { %1306 = vmatmul.mubr.msk.bf16.vlgmr.msra.gmra.mrb[4].mxu1 %vm458_vm2, %v1891_v29  ;;  %1335 = vmatprep.mubr.msk.bf16.mxu0 %vm1622_vm1, %v1621_v6 }
 0x16d   : > { %1310 = vmatpush3.bf16.msra.mxu1 %v451_v27  ;;  %1311 = vmatprep.mubr.msk.bf16.mxu1 %vm1622_vm1, %v1621_v6 }
 0x16e   : > { %1321 = vmatprep.subr.bf16.mxu1 %v1444_v31 }
 0x174   : > { %1312 = vmatmul.mubr.msk.bf16.vlgmr.msra.gmra.mrb[8].mxu1 %vm458_vm2, %v1903_v30 }
 0x175   : > { %1322 = vmatpush3.bf16.msra.mxu1 %v1444_v31 }
 0x176   : > { %1323 = vmatprep.subr.bf16.mxu1 %v1445_v32 }
 0x179   : > { %1324 = vmatpush3.bf16.msra.mxu1 %v1445_v32 }
 0x17a   : > { %1345 = vmatprep.subr.bf16.mxu1 %v1621_v6 }
 0x237   : > { %v496_v33 = vpop.f32.mrb[0].mxu1 }
 0x238   : > { %v1301_v34 = vpop.f32.mrb[1].mxu1 }
 0x239   : > { %v499_v35 = vpop.f32.mrb[2].mxu1 }
 0x23a   : > { %v650_v36 = vpack.c.bf16 %v499_v35, %v496_v33  ;;  %v1302_v37 = vpop.f32.mrb[3].mxu1 }
 0x23c   : > { %1325 = vmatprep.mubr.msk.bf16.mxu1 %vm363_vm0, %v650_v36 }
 0x23e   : > { %v643_v38 = vpop.f32.mrb[8].mxu0 }
 0x23f   : > { %v545_v39 = vpop.f32.mrb[4].mxu1  ;;  %v1319_v40 = vpop.f32.mrb[9].mxu0 }
 0x240   : > { %v1307_v41 = vpop.f32.mrb[5].mxu1  ;;  %v646_v42 = vpop.f32.mrb[10].mxu0 }
 0x241   : > { %v548_v43 = vpop.f32.mrb[6].mxu1  ;;  %v653_v44 = vpack.c.bf16 %v646_v42, %v643_v38  ;;  %v1320_v45 = vpop.f32.mrb[11].mxu0 }
 0x242   : > { %v651_v46 = vpack.c.bf16 %v548_v43, %v545_v39  ;;  %v1308_v47 = vpop.f32.mrb[7].mxu1 }
 0x244   : > { %1326 = vmatmul.mubr.msk.bf16.vlgmr.msra.gmra.mrb[12].mxu1 %vm363_vm0, %v651_v46 }
 0x247   : > { %v594_v48 = vpop.f32.mrb[8].mxu1 }
 0x248   : > { %v1313_v49 = vpop.f32.mrb[9].mxu1 }
 0x249   : > { %v597_v50 = vpop.f32.mrb[10].mxu1 }
 0x24a   : > { %v652_v51 = vpack.c.bf16 %v597_v50, %v594_v48  ;;  %v1314_v52 = vpop.f32.mrb[11].mxu1 }
 0x24c   : > { %1329 = vmatprep.mubr.msk.bf16.mxu1 %vm363_vm0, %v652_v51 }
 0x24d   : > { %1330 = vmatmul.mubr.msk.bf16.gmra.mrb[16].mxu1 %vm363_vm0, %v653_v44 }
 0x24e   : > { %1347 = vmatprep.mubr.msk.bf16.mxu1 %vm1622_vm1, %v1621_v6 }
 0x317   : > { %v1327_v53 = vpop.f32.mrb[12].mxu1 }
 0x318   : > { %v712_v54 = vpop.f32.mrb[13].mxu1  ;;  %v745_v56 = vmax.f32 %v1327_v53, 0.0 }
 0x319   : > { %v1328_v55 = vpop.f32.mrb[14].mxu1  ;;  %v743_v59 = vmax.f32 %v712_v54, 0.0 }
 0x31a   : > { %v746_v57 = vmax.f32 %v1328_v55, 0.0  ;;  %v715_v58 = vpop.f32.mrb[15].mxu1 }
 0x31b   : > { %v744_v60 = vmax.f32 %v715_v58, 0.0 }
 0x31c   : > { %v752_v61 = vpack.c.bf16 %v746_v57, %v745_v56 }
 0x31d   : > { %v751_v62 = vpack.c.bf16 %v744_v60, %v743_v59 }
 0x31f   : > { %1334 = vmatpush3.bf16.msra.mxu0 %v751_v62 }
 0x320   : > { %v1331_v63 = vpop.f32.mrb[16].mxu1  ;;  %1339 = vmatprep.subr.bf16.mxu0 %v1621_v6 }
 0x321   : > { %v749_v0 = vmax.f32 %v1331_v63, 0.0  ;;  %v728_v1 = vpop.f32.mrb[17].mxu1 }
 0x322   : > { %v747_v2 = vmax.f32 %v728_v1, 0.0  ;;  %v1332_v3 = vpop.f32.mrb[18].mxu1  ;;  %1336 = vmatmul.mubr.msk.bf16.vlgmr.msra.gmra.mrb[12].mxu0 %vm458_vm2, %v1879_v17 }
 0x323   : > { %v750_v4 = vmax.f32 %v1332_v3, 0.0  ;;  %v731_v5 = vpop.f32.mrb[19].mxu1  ;;  %1340 = vmatpush3.bf16.msra.mxu0 %v752_v61  ;;  %1341 = vmatprep.mubr.msk.bf16.mxu0 %vm1622_vm1, %v1621_v6 }
 0x324   : > { %v748_v7 = vmax.f32 %v731_v5, 0.0  ;;  %1351 = vmatprep.subr.bf16.mxu0 %v1621_v6 }
 0x325   : > { %v754_v8 = vpack.c.bf16 %v750_v4, %v749_v0 }
 0x326   : > { %v753_v9 = vpack.c.bf16 %v748_v7, %v747_v2 }
 0x328   : > { %1346 = vmatpush3.bf16.msra.mxu1 %v753_v9 }
 0x329   : > { %1357 = vmatprep.subr.bf16.mxu1 %v1621_v6 }
 0x32a   : > { %1342 = vmatmul.mubr.msk.bf16.vlgmr.msra.gmra.mrb[16].mxu0 %vm458_vm2, %v1891_v29 }
 0x32b   : > { %1352 = vmatpush3.bf16.msra.mxu0 %v754_v8  ;;  %1348 = vmatmul.mubr.msk.bf16.vlgmr.msra.gmra.mrb[20].mxu1 %vm458_vm2, %v1903_v30 }
 0x32c   : > { %1353 = vmatprep.mubr.msk.bf16.mxu0 %vm1622_vm1, %v1621_v6  ;;  %1361 = vmatprep.mubr.msk.bf16.mxu1 %vm1622_vm1, %v1621_v6 }
 0x32d   : > { %1358 = vmatpush3.bf16.msra.mxu1 %v1446_v10 }
 0x32e   : > { %1359 = vmatprep.subr.bf16.mxu1 %v1621_v6 }
 0x331   : > { %1360 = vmatpush3.bf16.msra.mxu1 %v1447_v11 }
 0x332   : > { %1354 = vmatmul.mubr.msk.bf16.vlgmr.msra.gmra.mrb[20].mxu0 %vm458_vm2, %v1888_v28 }
 0x3f5   : > { %v789_v12 = vpop.f32.mrb[12].mxu0 }
 0x3f6   : > { %v1337_v13 = vpop.f32.mrb[13].mxu0  ;;  %v919_v15 = vsel %vm363_vm0, %v789_v12, -inf }
 0x3f7   : > { %v792_v14 = vpop.f32.mrb[14].mxu0 }
 0x3f8   : > { %v920_v16 = vsel %vm363_vm0, %v792_v14, -inf  ;;  %v1338_v17 = vpop.f32.mrb[15].mxu0 }
 0x3f9   : > { %v921_v18 = vmax.f32 %v919_v15, %v920_v16 }
 0x3fb   : > { %v922_v19 = vrot.slane %v921_v18, 4 }
 0x3fd   : > { %v923_v20 = vmax.f32 %v921_v18, %v922_v19  ;;  %v830_v21 = vpop.f32.mrb[16].mxu0 }
 0x3fe   : > { %v1343_v22 = vpop.f32.mrb[17].mxu0  ;;  %v871_v23 = vpop.f32.mrb[20].mxu1  ;;  %v928_v27 = vsel %vm363_vm0, %v830_v21, -inf }
 0x3ff   : > { %v924_v6 = vrot.slane %v923_v20, 2  ;;  %v937_v24 = vsel %vm363_vm0, %v871_v23, -inf  ;;  %v833_v25 = vpop.f32.mrb[18].mxu0  ;;  %v1349_v26 = vpop.f32.mrb[21].mxu1  ;;  %v1623_v23 = vmov 1966171168  }
 0x400   : > { %v929_v28 = vsel %vm363_vm0, %v833_v25, -inf  ;;  %v874_v29 = vpop.f32.mrb[22].mxu1  ;;  %v1344_v30 = vpop.f32.mrb[19].mxu0 }
 0x401   : > { %v925_v31 = vmax.f32 %v923_v20, %v924_v6  ;;  %v930_v32 = vmax.f32 %v928_v27, %v929_v28  ;;  %v938_v33 = vsel %vm363_vm0, %v874_v29, -inf  ;;  %v1350_v34 = vpop.f32.mrb[23].mxu1  ;;  %v1045_v6 = vunpack.c.l.s4 %v1623_v23 }
 0x402   : > { %v939_v35 = vmax.f32 %v937_v24, %v938_v33  ;;  %v1047_v24 = vlaneseq }
 0x403   : > { %v931_v36 = vrot.slane %v930_v32, 4  ;;  %v926_v38 = vrot.slane %v925_v31, 1  ;;  %v1046_v25 = vunpack.c.0.s8 %v1045_v6 }
 0x404   : > { %v940_v37 = vrot.slane %v939_v35, 4  ;;  %v1048_v26 = vshrl.u32 %v1047_v24, 7 }
 0x405   : > { %v932_v39 = vmax.f32 %v930_v32, %v931_v36  ;;  %v912_v40 = vpop.f32.mrb[20].mxu0  ;;  %v927_v49 = vmax.f32 %v925_v31, %v926_v38 }
 0x406   : > { %v941_v41 = vmax.f32 %v939_v35, %v940_v37  ;;  %v1355_v42 = vpop.f32.mrb[21].mxu0  ;;  %v946_v46 = vsel %vm363_vm0, %v912_v40, -inf  ;;  %v1049_v29 = vsub.s32 %v1046_v25, %v1048_v26 }
 0x407   : > { %v933_v43 = vrot.slane %v932_v39, 2  ;;  %v915_v44 = vpop.f32.mrb[22].mxu0  ;;  %v955_v56 = vpack.c.bf16 %v927_v49, %v927_v49 }
 0x408   : > { %v942_v45 = vrot.slane %v941_v41, 2  ;;  %v947_v47 = vsel %vm363_vm0, %v915_v44, -inf  ;;  %v1356_v48 = vpop.f32.mrb[23].mxu0 }
 0x409   : > { %v934_v50 = vmax.f32 %v932_v39, %v933_v43  ;;  %v948_v51 = vmax.f32 %v946_v46, %v947_v47  ;;  %v963_v63 = vunpack.c.l.b16 %v955_v56 }
 0x40a   : > { %v943_v52 = vmax.f32 %v941_v41, %v942_v45 }
 0x40b   : > { %v935_v53 = vrot.slane %v934_v50, 1  ;;  %v949_v54 = vrot.slane %v948_v51, 4 }
 0x40c   : > { %v944_v55 = vrot.slane %v943_v52, 1 }
 0x40d   : > { %v936_v57 = vmax.f32 %v934_v50, %v935_v53  ;;  %v950_v58 = vmax.f32 %v948_v51, %v949_v54 }
 0x40e   : > { %v945_v59 = vmax.f32 %v943_v52, %v944_v55 }
 0x40f   : > { %v956_v60 = vpack.c.bf16 %v936_v57, %v936_v57  ;;  %v951_v61 = vrot.slane %v950_v58, 2 }
 0x410   : > { %v957_v62 = vpack.c.bf16 %v945_v59, %v945_v59 }
 0x411   : > { %v964_v0 = vunpack.c.l.b16 %v956_v60  ;;  %v952_v1 = vmax.f32 %v950_v58, %v951_v61 }
 0x412   : > { %v965_v2 = vunpack.c.l.b16 %v957_v62 }
 0x413   : > { %v968_v3 = vsel %vm967_vm3, %v964_v0, %v963_v63  ;;  %v953_v4 = vrot.slane %v952_v1, 1 }
 0x414   : > { %v970_v5 = vsel %vm969_vm4, %v965_v2, %v968_v3 }
 0x415   : > { %v954_v7 = vmax.f32 %v952_v1, %v953_v4 }
 0x417   : > { %v958_v8 = vpack.c.bf16 %v954_v7, %v954_v7 }
 0x419   : > { %v966_v9 = vunpack.c.l.b16 %v958_v8 }
 0x41b   : > { %v972_v10 = vsel %vm971_vm5, %v966_v9, %v970_v5 }
 0x41c   : > { %v973_v11 = vpack.c.b16 %v972_v10, %v972_v10 }
 0x41e   : > { %1362 = vmatmul.mubr.msk.bf16.vlgmr.msra.gmra.mrb[24].mxu1 %vm363_vm0, %v973_v11 }
 0x4f1   : > { %v1023_v12 = vpop.f32.mrb[24].mxu1 }
 0x4f2   : > { %v1363_v13 = vpop.f32.mrb[25].mxu1  ;;  %v1030_v14 = vsel %vm1029_vm6, %v1023_v12, -inf }
 0x4f3   : > { %1031 = vmax.xlane.f32.xlu0 %v1030_v14  ;;  %v1026_v15 = vpop.f32.mrb[26].mxu1 }
 0x4f4   : > { %v1364_v16 = vpop.f32.mrb[27].mxu1 }
 0x580   : > { %v1032_v17 = vpop.xlane.xlu0 %1031 }
 0x581   : > { %v1033_v18 = vsub.f32 %v1023_v12, %v1032_v17 }
 0x583   : > { %v1034_v19 = vmul.f32 1.442695, %v1033_v18 }
 0x585   : > { %1448 = vpow2.f32 %v1034_v19 }
 0x58f   : > { %v1449_v20 = vpop.eup %1448 }
 0x590   : > { %v1036_v21 = vsel %vm1029_vm6, %v1449_v20, 0.0 }
 0x591   : > { %1037 = vadd.xlane.f32.xlu0 %v1036_v21 }
 0x61e   : > { %v1038_v22 = vpop.xlane.xlu0 %1037 }
 0x61f   : > { %1450 = vlog2.f32 %v1038_v22 }
 0x629   : > { %v1451_v27 = vpop.eup %1450 }
 0x62a   : > { %v1040_v28 = vmul.f32 0.6931472, %v1451_v27 }
 0x62c   : > { %v1041_v30 = vadd.f32 %v1040_v28, %v1032_v17 }
 0x62e   : > { %v1042_v31 = vsub.f32 %v1023_v12, %v1041_v30 }
 0x630   : > { %v1050_v32 = vrot.slane %v1042_v31, %v1049_v29 }
 0x632   : > { %v1051_v33 = vcombine.high %v1050_v32, %v1050_v32  ;;  %v1058_v34 = vrot.slane %v1050_v32, %v1049_v29 }
 0x634   : > { %v1065_v35 = vrot.slane %v1051_v33, %v1049_v29  ;;  %v1066_v36 = vcombine.high %v1058_v34, %v1058_v34  ;;  %1073 = vst.msk [vmem:[%s298_s28] sm:$0x1] %vm1072_vm7, %v1058_v34 }
 0x636   : > { %v1067_v37 = vcombine.high %v1065_v35, %v1065_v35  ;;  %1074 = vst.msk [vmem:[%s298_s28 + $0x1] sm:$0x1] %vm1072_vm7, %v1065_v35  ;;  %1075 = vst.msk [vmem:[%s298_s28 + $0x2] sm:$0x1] %vm1072_vm7, %v1066_v36 }
 0x638   : > { %1076 = vst.msk [vmem:[%s298_s28 + $0x3] sm:$0x1] %vm1072_vm7, %v1067_v37 }
 0x639   : > { %1553 = shalt.err (!%p1550_p6)
}
 0x63a   : > { %s1554_s17 = scalar_lea.hbm %s1952_s15, 64  ;;  %s1558_s6 = scalar_lea.hbm %s2003_s5, 128 }
 0x63b   : > { %p1555_p8 = scmp.ne.s32.totalorder %s1952_s15, %s1554_s17  ;;  %p1559_p4 = scmp.lt.u32.totalorder %s1952_s15, %s2003_s5 }
 0x63c   : > { %p1560_p11 = scmp.lt.u32.totalorder %s1558_s6, %s1554_s17  ;;  %p1562_p3 = scmp.lt.u32.totalorder %s1554_s17, %s1952_s15 }
 0x63d   : > { %p1556_p10 = pnand %p1555_p8, %p1751_p12 }
 0x63e   : > { %p1561_p13 = por %p1560_p11, %p1559_p4 }
 0x63f   : > { %p1557_p0 = pneg %p1556_p10 }
 0x640   : > { %p1563_p7 = por %p1562_p3, %p1561_p13 }
 0x642   : > { %p1564_p9 = pnand %p1563_p7, %p1557_p0 }
 0x644   : > { %1567 = shalt.err (!%p1564_p9)
}
 0x645   : > { %s1625_s16 = smov 16   ;;  %s1626_s10 = smov 1  }
 0x646   : > { %1373 = dma.vmem_to_hbm [thread:$0]  (%p1751_p12), %s1954_s7, 64, %s1952_s15, %s1078_s22, %s1625_s16, %s1625_s16, %s1626_s10  }
 0x647 PF: > { %s1106_s3 = sand.u32 1, %s1602_s18   ;;  %p2031_p1 = scmp.ne.s32.totalorder %s2016_s25, 0 }
 0x648   : > { %p2032_p5 = scmp.ge.s32.totalorder %s1614_s21, 2  ;;  %s1107_s11 = scalar_lea.sflag [#allocation4], %s1106_s3 }
 0x64a   : > { %p1387_p2 = pnand %p2032_p5, %p2031_p1 }
 0x64c   : > { %1597 = dma.done.wait (!%p1387_p2), %s1107_s11, 64  }
 0x64d   : > { %1599 = vsyncadd (!%p1387_p2), %s1107_s11, 4294967232  ;;  %s2033_s28 = sld [smem:[#allocation13_spill]]  ;;  %s2034_s20 = sld [smem:[#allocation14_spill]] }
 0x64e   : > { %p21_p6 = scmp.ge.s32.totalorder %s1713_s30, 4   ;;  %s2035_s18 = smov %s1606_s19 }
 0x64f   : > { %s2037_s21 = smov %s1713_s30 }
 0x650   :  { %23 = sbr.rel (!%p21_p6) target bundleno = 10 (0xa), region = 102 }
 0x653   : > { %s2036_s19 = smov %s2033_s28 }
 0x657   :  { %1112 = vsyncpa [#allocation3], 1 }
 0x658   :  { %1114 = vsyncpa [#allocation3 + $0x1], 1 }
 0x659   :  { %1115 = vsyncpa [#allocation6], 1 }
 0x65a   :  { %1117 = vsyncpa [#allocation6 + $0x1], 1 }
 0x65b   :  { %1118 = vsyncpa [#allocation4], 1 }
 0x65c   :  { %1120 = vsyncpa [#allocation4 + $0x1], 1 }

</bundles_post_ra>
